<compile_context>
chip_gen: v7x
topology: tpu7x:2x2x1
jax: 0.10.0
libtpu: 0.0.40
codegen_flags: <defaults>
</compile_context>

<pallas_src>
import functools

import jax
import jax.numpy as jnp
from jax.experimental import pallas as pl
from jax.experimental.pallas import tpu as pltpu


def _round_up(v, m):
    return (v + m - 1) // m * m


def _ensemble_kernel(x_ref, w1_ref, b1_ref, w2_ref, b2_ref, o_ref, pooled_acc,
                     *, inv_hw, compute_dtype):
    # x_ref      : [TB, C, THW]  streamed input tile (NCHW, spatial flattened)
    # w1_ref     : [C, NHp]      fused first-layer weights
    # b1_ref     : [1, NHp]      fused first-layer bias (f32)
    # w2_ref     : [NHp, K]      fused second-layer weights (1/N folded in)
    # b2_ref     : [1, K]        summed second-layer bias   (1/N folded in, f32)
    # o_ref      : [TB, 1, K]    averaged ensemble logits
    # pooled_acc : [TB, C] f32   running spatial-sum accumulator (VMEM scratch)
    t = pl.program_id(1)

    @pl.when(t == 0)
    def _():
        pooled_acc[...] = jnp.zeros_like(pooled_acc)

    # Partial spatial sum over this HW tile; upcast bf16 stream to f32 before
    # accumulating (VPU filler hidden under the DMA stream).
    pooled_acc[...] += jnp.sum(x_ref[...].astype(jnp.float32), axis=-1)

    @pl.when(t == pl.num_programs(1) - 1)
    def _():
        # Normalize the mean in f32 first, then cast for the MXU matmuls.
        pooled = (pooled_acc[...] * inv_hw).astype(compute_dtype)   # [TB, C]
        h = jnp.dot(pooled, w1_ref[...],
                    preferred_element_type=jnp.float32) + b1_ref[...]
        h = jnp.maximum(h, 0.0)                                     # ReLU, f32
        y = jnp.dot(h.astype(compute_dtype), w2_ref[...],
                    preferred_element_type=jnp.float32) + b2_ref[...]
        o_ref[...] = y[:, None, :].astype(o_ref.dtype)


def _prepare_fused_weights(w1, b1, w2, b2, compute_dtype):
    """Fuse per-model weights into two dense matrices, fold 1/N, and zero-pad
    the fused contraction dim to a multiple of 128 (MXU tile)."""
    N, C, HID = w1.shape
    K = w2.shape[-1]
    NH = N * HID
    NHp = _round_up(NH, 128)
    inv_n = 1.0 / float(N)

    # W1[c, m*HID + j] = w1[m, c, j]
    W1 = jnp.transpose(w1, (1, 0, 2)).reshape(C, NH)
    B1 = b1.reshape(1, NH)
    # W2[m*HID + j, k] = w2[m, j, k] ; ensemble's 1/N folded into W2 & b2.
    W2 = w2.reshape(NH, K) * inv_n
    B2 = jnp.sum(b2, axis=0, keepdims=True) * inv_n                 # [1, K]

    # Zero-pad fused hidden dim: padded cols give relu(0+0)=0 and padded W2
    # rows are zero, so the result is exact.
    W1 = jnp.pad(W1, ((0, 0), (0, NHp - NH)))
    B1 = jnp.pad(B1, ((0, 0), (0, NHp - NH)))
    W2 = jnp.pad(W2, ((0, NHp - NH), (0, 0)))

    return (W1.astype(compute_dtype), B1.astype(jnp.float32),
            W2.astype(compute_dtype), B2.astype(jnp.float32))


def _tpu_budgets():
    """(x-block target bytes, scoped-VMEM limit bytes) per TPU generation."""
    kind = ""
    try:
        kind = jax.devices()[0].device_kind.lower()
    except Exception:
        pass
    if "v5" in kind:              # v5e: keep blocks ~4 MiB, raise scoped limit
        target, limit = 4 << 20, 64 << 20
    elif "v6" in kind:            # v6e: 128 MiB VMEM -> bigger blocks are free
        target, limit = 12 << 20, 96 << 20
    elif "7" in kind:             # v7x: only 64 MiB/TC, but per-step overhead
        target, limit = 8 << 20, 48 << 20   # is a larger fraction of time
    else:                         # unknown generation: middle of the road
        target, limit = 8 << 20, 64 << 20
    try:                          # never ask for more than ~3/4 of physical
        phys = int(pltpu.get_tpu_info().vmem_capacity_bytes)
        limit = min(limit, phys * 3 // 4)
    except Exception:
        pass
    return target, limit


def _choose_batch_tile(B):
    """Largest divisor of B that is <= 8 and leaves >= 2 batch grid steps, so
    dimension_semantics=('parallel', ...) can shard the stream across both
    v7x TensorCores (harmless extra grid steps on v5e/v6e)."""
    if B < 2:
        # TODO(synk): for B == 1 a megacore split would need two partial HW
        #             accumulators + a combine; not worth it for this module.
        return 1
    cap = min(8, B // 2)
    for d in range(cap, 0, -1):
        if B % d == 0:
            return d
    return 1


def _choose_hw_tile(hw_padded, bytes_per_hw_elem, block_budget_bytes):
    """Largest multiple-of-128 divisor of hw_padded whose x block stays within
    block_budget_bytes (hw_padded is already a multiple of 128)."""
    t = (block_budget_bytes // max(bytes_per_hw_elem, 1)) // 128 * 128
    t = max(128, min(t, hw_padded))
    while hw_padded % t:
        t -= 128
    return t


def fusion_ensemble_forward(x_nchw, w1, b1, w2, b2, *,
                            compute_dtype=jnp.bfloat16,
                            stream_dtype=jnp.bfloat16,
                            hw_tile=None):
    """x_nchw: [B, C, H, W] f32; per-model weights w1 [N,C,HID], b1 [N,HID],
    w2 [N,HID,K], b2 [N,K]. Returns averaged ensemble logits [B, K] (f32)."""
    B, C, H, W = x_nchw.shape
    N, _, HID = w1.shape
    K = w2.shape[-1]
    HW = H * W
    HWp = _round_up(HW, 128)

    # Stream x in a compact dtype (bf16 halves HBM traffic); zero-padding HW
    # to a 128 multiple is exact for the spatial sum (mean divides by true HW).
    x = x_nchw.reshape(B, C, HW).astype(stream_dtype)
    if HWp != HW:
        x = jnp.pad(x, ((0, 0), (0, 0), (0, HWp - HW)))

    W1f, B1f, W2f, B2f = _prepare_fused_weights(w1, b1, w2, b2, compute_dtype)
    NHp = W1f.shape[1]

    target_block, vmem_limit = _tpu_budgets()

    x_item = jnp.dtype(stream_dtype).itemsize
    w_item = jnp.dtype(compute_dtype).itemsize
    sub_x = 32 // x_item          # sublane pack: 8 rows (f32) / 16 rows (bf16)
    sub_w = 32 // w_item

    TB = _choose_batch_tile(B)

    # VMEM reserved outside the streamed x blocks.  The constant-index weight
    # blocks are DMA'd once but still get the default 2-deep buffers; they are
    # tiny next to the x stream, so we just account for 2x here.
    reserved = 2 * (_round_up(C, sub_w) * NHp * w_item          # W1
                    + 8 * NHp * 4                               # b1 (f32)
                    + NHp * K * w_item                          # W2
                    + 8 * K * 4                                 # b2 (f32)
                    + 8 * _round_up(K, 128) * 4)                # out block
    reserved += _round_up(TB, 8) * _round_up(C, 128) * 4        # pooled_acc
    reserved += 2 << 20                                         # margin
    x_block_budget = min(target_block, max(1, (vmem_limit - reserved) // 2))

    # If even a 128-wide block overshoots the budget (huge TB*C), shrink the
    # batch tile rather than blowing scoped VMEM.
    while TB > 1 and TB * _round_up(C, sub_x) * 128 * x_item > x_block_budget:
        TB = next(d for d in range(TB - 1, 0, -1) if B % d == 0)

    if hw_tile is None:
        hw_tile = _choose_hw_tile(HWp, TB * _round_up(C, sub_x) * x_item,
                                  x_block_budget)
    assert HWp % hw_tile == 0 and B % TB == 0

    grid = (B // TB, HWp // hw_tile)
    kernel = functools.partial(_ensemble_kernel,
                               inv_hw=1.0 / float(HW),
                               compute_dtype=compute_dtype)

    # NOTE: C stays the (full-dim) sublane axis of the x block; flattening
    # (B, C) would break the full-dim alignment exception once TB < B.
    out3 = pl.pallas_call(
        kernel,
        out_shape=jax.ShapeDtypeStruct((B, 1, K), jnp.float32),
        grid=grid,
        in_specs=[
            # streamed / double-buffered input tiles
            pl.BlockSpec((TB, C, hw_tile), lambda b, t: (b, 0, t)),
            # resident fused weights (constant block index -> DMA'd once)
            pl.BlockSpec((C, NHp), lambda b, t: (0, 0)),
            pl.BlockSpec((1, NHp), lambda b, t: (0, 0)),
            pl.BlockSpec((NHp, K), lambda b, t: (0, 0)),
            pl.BlockSpec((1, K), lambda b, t: (0, 0)),
        ],
        out_specs=pl.BlockSpec((TB, 1, K), lambda b, t: (b, 0, 0)),
        scratch_shapes=[pltpu.VMEM((TB, C), jnp.float32)],
        compiler_params=pltpu.CompilerParams(
            dimension_semantics=("parallel", "arbitrary"),
            vmem_limit_bytes=int(vmem_limit)),
    )(x, W1f, B1f, W2f, B2f)
    return out3.reshape(B, K)


def _reference(x_nchw, w1, b1, w2, b2):
    # Pure-JAX reference mirroring the PyTorch forward loop (f32 throughout).
    pooled = jnp.mean(x_nchw, axis=(2, 3))          # [B, C]
    res = None
    for m in range(w1.shape[0]):
        h = jnp.maximum(pooled @ w1[m] + b1[m], 0.0)
        y = h @ w2[m] + b2[m]
        res = y if res is None else res + y
    return res / w1.shape[0]


if __name__ == "__main__":
    # Small shapes consistent with the forward: image batch, N ensemble models.
    B, C, H, W = 2, 4, 16, 16
    N = 3          # number of models in the ensemble
    HID = 32       # per-model hidden width (fused contraction = 96 -> pad 128)
    K = 128        # number of output classes (lane-dense)

    key = jax.random.PRNGKey(0)
    kx, k1, k2, k3, k4 = jax.random.split(key, 5)
    x = jax.random.normal(kx, (B, C, H, W), dtype=jnp.float32)
    w1 = jax.random.normal(k1, (N, C, HID), dtype=jnp.float32) * 0.1
    b1 = jax.random.normal(k2, (N, HID), dtype=jnp.float32) * 0.01
    w2 = jax.random.normal(k3, (N, HID, K), dtype=jnp.float32) * 0.1
    b2 = jax.random.normal(k4, (N, K), dtype=jnp.float32) * 0.01

    ref = _reference(x, w1, b1, w2, b2)

    # Exact-algebra check: f32 stream + f32 weights, forced 2-step HW
    # reduction so the pl.when accumulator path across the "arbitrary" axis
    # is exercised (grid = (2, 2) with TB = 1).
    out_f32 = jax.block_until_ready(
        fusion_ensemble_forward(x, w1, b1, w2, b2,
                                compute_dtype=jnp.float32,
                                stream_dtype=jnp.float32,
                                hw_tile=128))
    assert out_f32.shape == (B, K)
    assert jnp.allclose(out_f32, ref, atol=1e-4, rtol=1e-4), \
        float(jnp.max(jnp.abs(out_f32 - ref)))

    # Fast default path: bf16-streamed x + bf16 weights, f32 accumulation and
    # f32 mean/bias/ReLU; auto-sized tiles + generation-aware VMEM budget.
    out_fast = jax.block_until_ready(
        fusion_ensemble_forward(x, w1, b1, w2, b2))
    assert out_fast.shape == (B, K)
    assert jnp.allclose(out_fast, ref, atol=1e-2, rtol=5e-2), \
        float(jnp.max(jnp.abs(out_fast - ref)))

    print("KERNEL_OK")
</pallas_src>

<mosaic_0001>
module attributes {stable_mosaic.version = 11 : i64} {
  func.func @_ensemble_kernel(%arg0: i32, %arg1: i32, %arg2: memref<1x4x128xf32, #tpu.memory_space<vmem>>, %arg3: memref<4x128xf32, #tpu.memory_space<vmem>>, %arg4: memref<1x128xf32, #tpu.memory_space<vmem>>, %arg5: memref<128x128xf32, #tpu.memory_space<vmem>>, %arg6: memref<1x128xf32, #tpu.memory_space<vmem>>, %arg7: memref<1x1x128xf32, #tpu.memory_space<vmem>>, %arg8: memref<1x4xf32, #tpu.memory_space<vmem>>) attributes {dimension_semantics = [#tpu.dimension_semantics<parallel>, #tpu.dimension_semantics<arbitrary>], iteration_bounds = array<i64: 2, 2>, scalar_prefetch = 0 : i64, scratch_operands = 1 : i64, tpu.core_type = #tpu.core_type<tc>, window_params = [{transform_indices = @transform_0, window_bounds = array<i64: 1, 4, 128>}, {pipeline_mode = #tpu.pipeline_mode<synchronous>, transform_indices = @transform_1, window_bounds = array<i64: 4, 128>}, {pipeline_mode = #tpu.pipeline_mode<synchronous>, transform_indices = @transform_2, window_bounds = array<i64: 1, 128>}, {pipeline_mode = #tpu.pipeline_mode<synchronous>, transform_indices = @transform_3, window_bounds = array<i64: 128, 128>}, {pipeline_mode = #tpu.pipeline_mode<synchronous>, transform_indices = @transform_4, window_bounds = array<i64: 1, 128>}, {transform_indices = @transform_5, window_bounds = array<i64: 1, 1, 128>}]} {
    %c0_i32 = arith.constant 0 : i32
    %0 = arith.cmpi eq, %arg1, %c0_i32 : i32
    %1 = arith.extui %0 : i1 to i32
    %c0_i32_0 = arith.constant 0 : i32
    %2 = arith.cmpi ne, %1, %c0_i32_0 : i32
    scf.if %2 {
      %cst_8 = arith.constant 0.000000e+00 : f32
      %11 = vector.broadcast %cst_8 : f32 to vector<1x4xf32>
      %c0_9 = arith.constant 0 : index
      %c0_10 = arith.constant 0 : index
      %12 = vector.load %arg8[%c0_9, %c0_10] : memref<1x4xf32, #tpu.memory_space<vmem>>, vector<1x4xf32>
      tpu.vector_store %arg8[%c0_9, %c0_10], %11 {strides = array<i32>} : memref<1x4xf32, #tpu.memory_space<vmem>>, vector<1x4xf32>,
    } else {
    }
    %c0 = arith.constant 0 : index
    %c0_1 = arith.constant 0 : index
    %3 = vector.load %arg8[%c0, %c0_1] : memref<1x4xf32, #tpu.memory_space<vmem>>, vector<1x4xf32>
    %c0_2 = arith.constant 0 : index
    %c0_3 = arith.constant 0 : index
    %c0_4 = arith.constant 0 : index
    %4 = vector.load %arg2[%c0_2, %c0_3, %c0_4] : memref<1x4x128xf32, #tpu.memory_space<vmem>>, vector<1x4x128xf32>
    %cst = arith.constant dense<0.000000e+00> : vector<1x4xf32>
    %5 = vector.multi_reduction <add>, %4, %cst [2] : vector<1x4x128xf32> to vector<1x4xf32>
    %6 = arith.addf %3, %5 : vector<1x4xf32>
    %c0_5 = arith.constant 0 : index
    %c0_6 = arith.constant 0 : index
    %7 = vector.load %arg8[%c0_5, %c0_6] : memref<1x4xf32, #tpu.memory_space<vmem>>, vector<1x4xf32>
    tpu.vector_store %arg8[%c0_5, %c0_6], %6 {strides = array<i32>} : memref<1x4xf32, #tpu.memory_space<vmem>>, vector<1x4xf32>,
    %c1_i32 = arith.constant 1 : i32
    %8 = arith.cmpi eq, %arg1, %c1_i32 : i32
    %9 = arith.extui %8 : i1 to i32
    %c0_i32_7 = arith.constant 0 : i32
    %10 = arith.cmpi ne, %9, %c0_i32_7 : i32
    scf.if %10 {
      %c0_8 = arith.constant 0 : index
      %c0_9 = arith.constant 0 : index
      %11 = vector.load %arg8[%c0_8, %c0_9] : memref<1x4xf32, #tpu.memory_space<vmem>>, vector<1x4xf32>
      %cst_10 = arith.constant 3.906250e-03 : f32
      %12 = vector.broadcast %cst_10 : f32 to vector<1x4xf32>
      %13 = arith.mulf %11, %12 : vector<1x4xf32>
      %c0_11 = arith.constant 0 : index
      %c0_12 = arith.constant 0 : index
      %14 = vector.load %arg3[%c0_11, %c0_12] : memref<4x128xf32, #tpu.memory_space<vmem>>, vector<4x128xf32>
      %cst_13 = arith.constant dense<0.000000e+00> : vector<1x128xf32>
      %15 = tpu.matmul %13, %14, %cst_13 {dimension_numbers = #tpu.dot_dimension_numbers<[1], [0], [0], [1], [0, 0, 1, 1], [], []>} : vector<1x4xf32>, vector<4x128xf32>, vector<1x128xf32> -> vector<1x128xf32>
      %c0_14 = arith.constant 0 : index
      %c0_15 = arith.constant 0 : index
      %16 = vector.load %arg4[%c0_14, %c0_15] : memref<1x128xf32, #tpu.memory_space<vmem>>, vector<1x128xf32>
      %17 = arith.addf %15, %16 : vector<1x128xf32>
      %cst_16 = arith.constant 0.000000e+00 : f32
      %18 = vector.broadcast %cst_16 : f32 to vector<1x128xf32>
      %19 = arith.maximumf %17, %18 : vector<1x128xf32>
      %c0_17 = arith.constant 0 : index
      %c0_18 = arith.constant 0 : index
      %20 = vector.load %arg5[%c0_17, %c0_18] : memref<128x128xf32, #tpu.memory_space<vmem>>, vector<128x128xf32>
      %cst_19 = arith.constant dense<0.000000e+00> : vector<1x128xf32>
      %21 = tpu.matmul %19, %20, %cst_19 {dimension_numbers = #tpu.dot_dimension_numbers<[1], [0], [0], [1], [0, 0, 1, 1], [], []>} : vector<1x128xf32>, vector<128x128xf32>, vector<1x128xf32> -> vector<1x128xf32>
      %c0_20 = arith.constant 0 : index
      %c0_21 = arith.constant 0 : index
      %22 = vector.load %arg6[%c0_20, %c0_21] : memref<1x128xf32, #tpu.memory_space<vmem>>, vector<1x128xf32>
      %23 = arith.addf %21, %22 : vector<1x128xf32>
      %24 = vector.shape_cast %23 : vector<1x128xf32> to vector<1x1x128xf32>
      %c0_22 = arith.constant 0 : index
      %c0_23 = arith.constant 0 : index
      %c0_24 = arith.constant 0 : index
      %25 = vector.load %arg7[%c0_22, %c0_23, %c0_24] : memref<1x1x128xf32, #tpu.memory_space<vmem>>, vector<1x1x128xf32>
      tpu.vector_store %arg7[%c0_22, %c0_23, %c0_24], %24 {strides = array<i32>} : memref<1x1x128xf32, #tpu.memory_space<vmem>>, vector<1x1x128xf32>,
    } else {
    }
    return
  }
  func.func @transform_0(%arg0: i32, %arg1: i32) -> (i32, i32, i32) {
    %c0_i32 = arith.constant 0 : i32
    %c0_i32_0 = arith.constant 0 : i32
    return %arg0, %c0_i32, %arg1 : i32, i32, i32
  }
  func.func @transform_1(%arg0: i32, %arg1: i32) -> (i32, i32) {
    %c0_i32 = arith.constant 0 : i32
    %c0_i32_0 = arith.constant 0 : i32
    %c0_i32_1 = arith.constant 0 : i32
    return %c0_i32, %c0_i32_0 : i32, i32
  }
  func.func @transform_2(%arg0: i32, %arg1: i32) -> (i32, i32) {
    %c0_i32 = arith.constant 0 : i32
    %c0_i32_0 = arith.constant 0 : i32
    %c0_i32_1 = arith.constant 0 : i32
    return %c0_i32, %c0_i32_0 : i32, i32
  }
  func.func @transform_3(%arg0: i32, %arg1: i32) -> (i32, i32) {
    %c0_i32 = arith.constant 0 : i32
    %c0_i32_0 = arith.constant 0 : i32
    %c0_i32_1 = arith.constant 0 : i32
    return %c0_i32, %c0_i32_0 : i32, i32
  }
  func.func @transform_4(%arg0: i32, %arg1: i32) -> (i32, i32) {
    %c0_i32 = arith.constant 0 : i32
    %c0_i32_0 = arith.constant 0 : i32
    %c0_i32_1 = arith.constant 0 : i32
    return %c0_i32, %c0_i32_0 : i32, i32
  }
  func.func @transform_5(%arg0: i32, %arg1: i32) -> (i32, i32, i32) {
    %c0_i32 = arith.constant 0 : i32
    %c0_i32_0 = arith.constant 0 : i32
    %c0_i32_1 = arith.constant 0 : i32
    return %arg0, %c0_i32, %c0_i32_0 : i32, i32, i32
  }
}

</mosaic_0001>

<bundles_post_ra>
// kernel: tpu_custom_call.1
= control target key start
LH: loop header
LB: loop body
LE: loop exit
PB: predicated region body
PF: predicated region fallthrough
CT: control target
= control target key end

     0   :  { %s1616_s0 = inlined_call_operand.hbm [shape: f32[2,4,256], index: 0, kind: input, shape index: {}]   ;;  %s1617_s1 = inlined_call_operand.hbm [shape: f32[4,128], index: 1, kind: input, shape index: {}]   ;;  %s1618_s2 = inlined_call_operand.hbm [shape: f32[1,128], index: 2, kind: input, shape index: {}]   ;;  %s1619_s3 = inlined_call_operand.hbm [shape: f32[128,128], index: 3, kind: input, shape index: {}]   ;;  %s1620_s4 = inlined_call_operand.hbm [shape: f32[1,128], index: 4, kind: input, shape index: {}]   ;;  %s1621_s5 = inlined_call_operand.hbm [shape: f32[2,1,128], index: 5, kind: output, shape index: {}]  }
   0x1   :  { %1629 = sst [smem:[#allocation20_spill]] %s1616_s0 }
   0x2   :  { %1630 = sst [smem:[#allocation21_spill]] %s1617_s1 }
   0x3   :  { %1631 = sst [smem:[#allocation22_spill]] %s1621_s5 }
   0x4   :  { %10 = vsyncpa [#allocation4], 0 }
   0x5   :  { %12 = vsyncpa [#allocation4 + $0x1], 0 }
   0x6   :  { %13 = vsyncpa [#allocation7], 0 }
   0x7   :  { %14 = vsyncpa [#allocation10], 0 }
   0x8   :  { %15 = vsyncpa [#allocation5], 0 }
   0x9   :  { %17 = vsyncpa [#allocation5 + $0x1], 0  ;;  %s1268_s18 = smov 0   ;;  %s1270_s19 = smov 0  }
   0xa   :  { %s1272_s20 = smov 0   ;;  %s1274_s21 = smov 0  }
   0xb   :  { %s1276_s22 = smov 0   ;;  %s1278_s23 = smov 0  }
   0xc   :  { %s1280_s24 = smov 0   ;;  %s1282_s25 = smov 0  }
   0xd   :  { %s1284_s26 = smov 0   ;;  %s1286_s27 = smov 0  }
   0xe   :  { %s1288_s28 = smov 0  }
   0xf LB: > { %1632 = sst [smem:[#allocation17_spill]] %s1206_s24  ;;  %s1622_s29 = sadd.s32 4294967295, %s1222_s28   ;;  %s1222_s28 = sphi %s1288_s28, %s23_s28   ;;  %s1218_s27 = sphi %s1286_s27, %s1668_s27   ;;  %s1214_s26 = sphi %s1284_s26, %s1667_s26   ;;  %s1210_s25 = sphi %s1282_s25, %s1666_s25   ;;  %s1206_s24 = sphi %s1280_s24, %s1665_s24   ;;  %s1202_s23 = sphi %s1278_s23, %s1664_s23   ;;  %s1198_s22 = sphi %s1276_s22, %s1663_s22   ;;  %s1194_s21 = sphi %s1274_s21, %s1662_s21   ;;  %s1190_s20 = sphi %s1272_s20, %s1661_s20   ;;  %s1186_s19 = sphi %s1270_s19, %s1660_s19   ;;  %s1182_s18 = sphi %s1268_s18, %s1659_s18  }
  0x10   : > { %1633 = sst [smem:[#allocation18_spill]] %s1210_s25  ;;  %p693_p0 = scmp.ge.s32.totalorder %s1222_s28, 1 }
  0x11   : > { %p1327_p1 = scmp.eq.s32.totalorder %s1622_s29, 0  ;;  %p178_p2 = scmp.lt.s32.totalorder %s1222_s28, 5 }
  0x12   : > { %s1224_s7 = smov [#allocation6]   ;;  %s1225_s9 = smov [#allocation9]  }
  0x13   : > { %s1634_s30 = scalar_select %p1327_p1, 1, 0 }
  0x14   : > { %p1332_p3 = pnand %p693_p0, %p178_p2  ;;  %s191_s8 = sshll.u32 %s1224_s7, 4  ;;  %s192_s8 = int_to_ptr.vmem [resolvable:$true] %s191_s8 }
  0x15   : > { %s212_s10 = sshll.u32 %s1225_s9, 4  ;;  %s1226_s12 = smov [#allocation8]   ;;  %s1338_s10 = int_to_ptr.vmem [resolvable:$true] %s212_s10 }
  0x16   : > { %s1635_s6 = scalar_select %p1332_p3, 1, 0 }
  0x17   : > { %p818_p4 = pneg %p1332_p3  ;;  %s1346_s13 = sshll.u32 %s1226_s12, 4  ;;  %s203_s13 = int_to_ptr.vmem [resolvable:$true] %s1346_s13 }
  0x18   : > { %1636 = sst [smem:[#allocation19_spill]] %s1635_s6  ;;  %s1638_s1 = sld [smem:[#allocation21_spill]] }
  0x19   : > { %p1342_p5 = pnand %p818_p4, %p1327_p1 }
  0x1b   : > { %p1356_p7 = pneg %p1342_p5 }
  0x1e   : > { %s950_s16 = scalar_lea.hbm %s1638_s1, 64 }
  0x1f   : > { %p951_p6 = scmp.ne.s32.totalorder %s1638_s1, %s950_s16  ;;  %p957_p10 = scmp.lt.u32.totalorder %s950_s16, %s1638_s1 }
  0x21   : > { %p953_p8 = pnand %p1356_p7, %p951_p6 }
  0x23   : > { %p954_p9 = pneg %p953_p8 }
  0x25   : > { %p959_p11 = pnand %p957_p10, %p954_p9 }
  0x27   : > { %962 = shalt.err (!%p959_p11)
}
  0x28   : > { %s963_s14 = scalar_lea.vmem %s192_s8, 64  ;;  %p971_p2 = scmp.lt.s32.totalorder %s192_s8, %s192_s8 }
  0x29   : > { %p964_p12 = scmp.ne.s32.totalorder %s192_s8, %s963_s14  ;;  %p972_p4 = scmp.lt.s32.totalorder %s963_s14, %s963_s14 }
  0x2b   : > { %p966_p13 = pnand %p964_p12, %p1356_p7  ;;  %p973_p3 = por %p972_p4, %p971_p2 }
  0x2d   : > { %p967_p0 = pneg %p966_p13 }
  0x2f   : > { %p974_p1 = pnand %p973_p3, %p967_p0 }
  0x31   : > { %977 = shalt.err (!%p974_p1)
}
  0x32   : > { %821 = dma.hbm_to_vmem [thread:$0]  (!%p1342_p5), %s1638_s1, 64, %s192_s8, [#allocation7]  }
  0x33   : > { %s978_s7 = scalar_lea.hbm %s1619_s3, 2048 }
  0x34   : > { %p979_p6 = scmp.ne.s32.totalorder %s1619_s3, %s978_s7  ;;  %p985_p1 = scmp.lt.u32.totalorder %s978_s7, %s1619_s3 }
  0x36   : > { %p981_p8 = pnand %p979_p6, %p1356_p7 }
  0x38   : > { %p982_p9 = pneg %p981_p8 }
  0x3a   : > { %p987_p3 = pnand %p985_p1, %p982_p9 }
  0x3c   : > { %990 = shalt.err (!%p987_p3)
}
  0x3d   : > { %s991_s8 = scalar_lea.vmem %s1338_s10, 2048  ;;  %p999_p13 = scmp.lt.s32.totalorder %s1338_s10, %s1338_s10 }
  0x3e   : > { %p992_p10 = scmp.ne.s32.totalorder %s1338_s10, %s991_s8  ;;  %p1000_p0 = scmp.lt.s32.totalorder %s991_s8, %s991_s8 }
  0x40   : > { %p994_p11 = pnand %p992_p10, %p1356_p7  ;;  %p1001_p2 = por %p1000_p0, %p999_p13 }
  0x42   : > { %p995_p12 = pneg %p994_p11 }
  0x44   : > { %p1002_p4 = pnand %p1001_p2, %p995_p12 }
  0x46   : > { %1005 = shalt.err (!%p1002_p4)
}
  0x47   : > { %s1227_s5 = smov 128   ;;  %s1228_s25 = smov 8  }
  0x48   : > { %827 = dma.hbm_to_vmem [thread:$0]  (!%p1342_p5), %s1619_s3, 2048, %s1338_s10, [#allocation10], %s1227_s5, %s1227_s5, %s1228_s25  }
  0x49   : > { %s1229_s29 = smov [#allocation11]   ;;  %s1006_s14 = scalar_lea.hbm %s1618_s2, 16 }
  0x4a   : > { %s226_s16 = sshll.u32 %s1229_s29, 4  ;;  %p1007_p6 = scmp.ne.s32.totalorder %s1618_s2, %s1006_s14  ;;  %s227_s16 = int_to_ptr.vmem [resolvable:$true] %s226_s16 }
  0x4b   : > { %p1013_p1 = scmp.lt.u32.totalorder %s1006_s14, %s1618_s2 }
  0x4c   : > { %p1009_p8 = pnand %p1007_p6, %p1356_p7 }
  0x4e   : > { %p1010_p9 = pneg %p1009_p8 }
  0x50   : > { %p1015_p3 = pnand %p1013_p1, %p1010_p9 }
  0x52   : > { %1018 = shalt.err (!%p1015_p3)
}
  0x53   : > { %s1019_s10 = scalar_lea.vmem %s203_s13, 16  ;;  %s1026_s5 = scalar_lea.vmem %s203_s13, 32 }
  0x54   : > { %p1020_p10 = scmp.ne.s32.totalorder %s203_s13, %s1019_s10  ;;  %p1027_p13 = scmp.lt.s32.totalorder %s203_s13, %s203_s13 }
  0x55   : > { %p1028_p0 = scmp.lt.s32.totalorder %s1026_s5, %s1019_s10 }
  0x56   : > { %p1022_p11 = pnand %p1020_p10, %p1356_p7 }
  0x57   : > { %p1029_p2 = por %p1028_p0, %p1027_p13 }
  0x58   : > { %p1023_p12 = pneg %p1022_p11 }
  0x5a   : > { %p1030_p4 = pnand %p1029_p2, %p1023_p12 }
  0x5c   : > { %1033 = shalt.err (!%p1030_p4)
}
  0x5d   : > { %824 = dma.hbm_to_vmem [thread:$0]  (!%p1342_p5), %s1618_s2, 16, %s203_s13, [#allocation7]  }
  0x5e   : > { %s1640_s24 = sadd.s32 4294967295, %s1222_s28   ;;  %s1034_s29 = scalar_lea.hbm %s1620_s4, 16 }
  0x5f   : > { %p1416_p6 = scmp.eq.s32.totalorder %s1640_s24, 3  ;;  %p1035_p8 = scmp.ne.s32.totalorder %s1620_s4, %s1034_s29 }
  0x60   : > { %p1041_p3 = scmp.lt.u32.totalorder %s1034_s29, %s1620_s4 }
  0x61   : > { %s1641_s6 = scalar_select %p1416_p6, 1, 0 }
  0x62   : > { %p1037_p9 = pnand %p1035_p8, %p1356_p7 }
  0x64   : > { %p1038_p1 = pneg %p1037_p9 }
  0x66   : > { %p1043_p10 = pnand %p1041_p3, %p1038_p1 }
  0x68   : > { %1046 = shalt.err (!%p1043_p10)
}
  0x69   : > { %s1047_s13 = scalar_lea.vmem %s227_s16, 16  ;;  %s1054_s10 = scalar_lea.vmem %s227_s16, 32 }
  0x6a   : > { %p1048_p11 = scmp.ne.s32.totalorder %s227_s16, %s1047_s13  ;;  %p1055_p0 = scmp.lt.s32.totalorder %s227_s16, %s227_s16 }
  0x6b   : > { %p1056_p2 = scmp.lt.s32.totalorder %s1054_s10, %s1047_s13 }
  0x6c   : > { %p1050_p12 = pnand %p1048_p11, %p1356_p7 }
  0x6d   : > { %p1057_p4 = por %p1056_p2, %p1055_p0 }
  0x6e   : > { %p1051_p13 = pneg %p1050_p12 }
  0x70   : > { %p1058_p6 = pnand %p1057_p4, %p1051_p13 }
  0x72   : > { %1061 = shalt.err (!%p1058_p6)
}
  0x73   : > { %830 = dma.hbm_to_vmem [thread:$0]  (!%p1342_p5), %s1620_s4, 16, %s227_s16, [#allocation10]  }
  0x74   : > { %s692_s11 = sadd.s32 4294967294, %s1222_s28   ;;  %s32_s9 = sadd.s32 1, %s1214_s26 }
  0x75   : > { %p33_p7 = scmp.ge.s32.totalorder %s32_s9, 2  ;;  %s35_s25 = sadd.s32 1, %s1218_s27 }
  0x76   : > { %s44_s24 = sadd.s32 1, %s1202_s23  ;;  %p51_p6 = scmp.ne.s32.totalorder %s1202_s23, %s1198_s22 }
  0x77   : > { %s1670_s9 = smov (%p33_p7, %s32_s9), 0  ;;  %s1672_s25 = smov (!%p33_p7, %s35_s25), %s1218_s27 }
  0x78   : > { %s40_s15 = ssub.s32 %s1214_s26, %s1670_s9  ;;  %p52_p8 = scmp.eq.s32.totalorder %s1222_s28, 0 }
  0x79   : > { %p37_p5 = scmp.ge.s32.totalorder %s1672_s25, 2  ;;  %p57_p9 = scmp.ne.s32.totalorder %s1198_s22, %s1194_s21 }
  0x7a   : > { %s154_s16 = sadd.s32 1, %s1190_s20  ;;  %p164_p1 = scmp.ne.s32.totalorder %s1190_s20, %s1186_s19 }
  0x7b   : > { %s1674_s25 = smov (%p37_p5, %s1672_s25), 0  ;;  %p1642_p3 = scmp.ne.s32.totalorder %s1634_s30, 0 }
  0x7c   : > { %p1644_p11 = scmp.ne.s32.totalorder %s1641_s6, 0  ;;  %s39_s21 = ssub.s32 %s1218_s27, %s1674_s25 }
  0x7d   : > { %p1459_p10 = por %p1642_p3, %p57_p9  ;;  %p170_p13 = scmp.ne.s32.totalorder %s1186_s19, %s1182_s18 }
  0x7e   : > { %p1465_p12 = por %p1644_p11, %p164_p1  ;;  %s41_s7 = sor.u32 %s40_s15, %s39_s21 }
  0x7f   : > { %p152_p0 = scmp.eq.s32.totalorder %s39_s21, 0  ;;  %p42_p2 = scmp.eq.s32.totalorder %s41_s7, 0 }
  0x80   : > { %s1645_s29 = scalar_select %p1465_p12, 1, 0 }
  0x81   : > { %p171_p4 = scmp.eq.s32.totalorder %s692_s11, 3  ;;  %p53_p7 = por %p52_p8, %p51_p6 }
  0x82   : > { %s1474_s12 = scalar_select %p152_p0, %s1190_s20, %s154_s16  }
  0x83   : > { %s1477_s14 = scalar_select %p42_p2, %s1202_s23, %s44_s24  }
  0x84   : > { %p1484_p5 = por %p171_p4, %p170_p13  ;;  %s237_s8 = sand.u32 1, %s1202_s23  }
  0x85   : > { %s700_s13 = sshll.u32 %s1218_s27, 1  ;;  %p843_p9 = scmp.lt.s32.totalorder %s1222_s28, 4 }
  0x86   : > { %s1646_s6 = scalar_select %p1484_p5, 1, 0 }
  0x87   : > { %s699_s10 = sshll.u32 %s237_s8, 2  ;;  %s246_s5 = sadd.s32 %s1214_s26, %s700_s13 }
  0x88   : > { %s701_s1 = sshll.u32 %s246_s5, 6  ;;  %s241_s15 = scalar_lea.vmem [#allocation3], %s699_s10 }
  0x89   : > { %s250_s21 = sshll.u32 %s241_s15, 4  ;;  %s1647_s0 = sld [smem:[#allocation20_spill]]  ;;  %s1497_s21 = int_to_ptr.vmem [resolvable:$true] %s250_s21 }
  0x8a   : > { %p1499_p6 = pnand %p843_p9, %p53_p7  ;;  %s238_s13 = scalar_lea.sflag [#allocation4], %s237_s8 }
  0x8c   : > { %p1064_p1 = pneg %p1499_p6 }
  0x8f   : > { %s1495_s24 = scalar_lea.hbm %s1647_s0, %s701_s1  ;;  %s1067_s15 = scalar_lea.hbm %s1647_s0, 256 }
  0x90   : > { %s1062_s10 = scalar_lea.hbm %s1495_s24, 64  ;;  %p1068_p13 = scmp.lt.u32.totalorder %s1495_s24, %s1647_s0 }
  0x91   : > { %p1063_p8 = scmp.ne.s32.totalorder %s1495_s24, %s1062_s10  ;;  %p1069_p0 = scmp.lt.u32.totalorder %s1067_s15, %s1062_s10 }
  0x92   : > { %p1071_p4 = scmp.lt.u32.totalorder %s1062_s10, %s1495_s24 }
  0x93   : > { %p1065_p3 = pnand %p1064_p1, %p1063_p8  ;;  %p1070_p2 = por %p1069_p0, %p1068_p13 }
  0x95   : > { %p1066_p11 = pneg %p1065_p3  ;;  %p1072_p7 = por %p1071_p4, %p1070_p2 }
  0x97   : > { %p1073_p9 = pnand %p1072_p7, %p1066_p11 }
  0x99   : > { %1076 = shalt.err (!%p1073_p9)
}
  0x9a   : > { %s1077_s8 = scalar_lea.vmem %s1497_s21, 64  ;;  %s1230_s5 = smov [#allocation3]  }
  0x9b   : > { %p1078_p8 = scmp.ne.s32.totalorder %s1497_s21, %s1077_s8  ;;  %s1082_s1 = sshll.u32 %s1230_s5, 4  ;;  %s1083_s1 = int_to_ptr.vmem [resolvable:$false] %s1082_s1 }
  0x9c   : > { %s1084_s11 = scalar_lea.vmem %s1083_s1, 128  ;;  %p1085_p12 = scmp.lt.s32.totalorder %s1497_s21, %s1083_s1 }
  0x9d   : > { %p1080_p3 = pnand %p1078_p8, %p1064_p1  ;;  %p1086_p13 = scmp.lt.s32.totalorder %s1084_s11, %s1077_s8 }
  0x9f   : > { %p1081_p5 = pneg %p1080_p3  ;;  %p1087_p0 = por %p1086_p13, %p1085_p12 }
  0xa1   : > { %p1088_p2 = pnand %p1087_p0, %p1081_p5 }
  0xa3   : > { %1091 = shalt.err (!%p1088_p2)
}
  0xa4   : > { %834 = dma.hbm_to_vmem [thread:$0]  (!%p1499_p6), %s1495_s24, 64, %s1497_s21, %s238_s13  }
  0xa5   : > { %s1649_s10 = sld [smem:[#allocation19_spill]] }
  0xab   : > { %p1650_p11 = scmp.ne.s32.totalorder %s1649_s10, 0 }
  0xac   : > { %s261_s15 = sand.u32 (!%p1650_p11), 1, %s1198_s22  }
  0xad   : > { %259 = sbr.rel (%p1650_p11) target bundleno = 959 (0x3bf), region = 40  ;;  %s703_s16 = sshll.u32 (!%p1650_p11), %s261_s15, 2 }
  0xae   : > { %s262_s5 = scalar_lea.sflag (!%p1650_p11), [#allocation4], %s261_s15  ;;  %s265_s0 = scalar_lea.vmem (!%p1650_p11), [#allocation3], %s703_s16 }
  0xb4   : > { %1165 = dma.done.wait (%p1459_p10), %s262_s5, 64  }
  0xb5   : > { %1167 = vsyncadd (%p1459_p10), %s262_s5, 4294967232  ;;  %p1651_p12 = scmp.ne.s32.totalorder %s1634_s30, 0 }
  0xb7   : > { %1169 = dma.done.wait (%p1651_p12), [#allocation7], 80  }
  0xb8   : > { %1171 = vsyncadd (%p1651_p12), [#allocation7], 4294967216 }
  0xb9   : > { %1173 = dma.done.wait (%p1651_p12), [#allocation10], 2064  }
  0xba   : > { %1175 = vsyncadd (%p1651_p12), [#allocation10], 4294965232  ;;  %s305_s21 = sand.u32 1, %s1186_s19   ;;  %s1652_s17 = sld [smem:[#allocation17_spill]] }
  0xbb   : > { %s1546_s24 = scalar_lea.vmem [#allocation12], %s305_s21 }
  0xc0   : > { %p708_p10 = scmp.ne.s32.totalorder %s1652_s17, 0 }
  0xc1   : > { %vm311_vm0 = vcmask (!%p708_p10), 24576   ;;  %v1231_v0 = vmov (!%p708_p10), 0.0  }
  0xc2   : > { %310 = sbr.rel (%p708_p10) target bundleno = 201 (0xc9), region = 64  ;;  %312 = vst.msk [vmem:[#allocation2] sm:$0x1] (!%p708_p10), %vm311_vm0, %v1231_v0 }
  0xc9 PF: > { %v314_v1 = vld [vmem:[%s265_s0] sm:$0xf]  ;;  %vm315_vm1 = vcmask 1043456   ;;  %v1232_v3 = vmov 0   ;;  %v320_v4 = vlaneseq  ;;  %v1233_v8 = vmov 1966171168  }
  0xca   : > { %v316_v2 = vsel %vm315_vm1, %v314_v1, 0.0  ;;  %949 = vset.pattern.permute.xlu0 %v1232_v3  ;;  %v339_v9 = vunpack.c.l.s4 %v1233_v8  ;;  %v313_v30 = vld [vmem:[#allocation2] sm:$0x1]  ;;  %vm385_vm2 = vcmask 24576   ;;  %s1653_s0 = sld [smem:[#allocation17_spill]] }
  0xcb   : > { %317 = vadd.xlane.f32.xlu0 %v316_v2  ;;  %v321_v5 = vshrl.u32 %v320_v4, 7  ;;  %v364_v6 = vand.u32 127, %v320_v4 }
  0xcc   : > { %v340_v10 = vunpack.c.0.s8 %v339_v9 }
  0xcd   : > { %v367_v7 = vsub.s32 %v364_v6, %v321_v5  ;;  %v322_v11 = vsub.s32 0, %v321_v5  ;;  %v326_v12 = vsub.s32 1, %v321_v5  ;;  %v330_v13 = vsub.s32 2, %v321_v5 }
  0xce   : > { %v334_v14 = vsub.s32 3, %v321_v5  ;;  %v343_v16 = vsub.s32 %v340_v10, %v321_v5 }
  0xd0   : > { %p709_p5 = scmp.ne.s32.totalorder %s1653_s0, 1 }
  0xd1   : > { %v393_v33 = vld [vmem:[#allocation6] sm:$0xf] (!%p709_p5)  ;;  %v1234_v35 = vmov (!%p709_p5), 0.0   ;;  %vm1235_vm3 = vmmov (!%p709_p5), 0   ;;  %vm395_vm4 = vcmask (!%p709_p5), 31744   ;;  %v473_v37 = vld [vmem:[#allocation9] sm:$0xff] (!%p709_p5) }
  0xd2   : > { %734 = vmatprep.subr.mxu0 (!%p709_p5), %v1234_v35  ;;  %736 = vmatprep.mubr.msk.f32.mxu0 (!%p709_p5), %vm1235_vm3, %v1234_v35  ;;  %v474_v38 = vld [vmem:[#allocation9 + $0x8] sm:$0xff] (!%p709_p5)  ;;  %v475_v39 = vld [vmem:[#allocation9 + $0x10] sm:$0xff] (!%p709_p5)  ;;  %v1236_v40 = vmov (!%p709_p5), 0.0|0.0   ;;  %v476_v42 = vld [vmem:[#allocation9 + $0x18] sm:$0xff] (!%p709_p5) }
  0xd3   : > { %735 = vmatpush3.msk.msra.mxu0 (!%p709_p5), %vm315_vm1, %v393_v33  ;;  %774 = vmatprep.subr.bf16.mxu1 (!%p709_p5), %v1236_v40  ;;  %v775_v41 = vpack.c.bf16 (!%p709_p5), %v474_v38, %v473_v37  ;;  %v778_v43 = vpack.c.bf16 (!%p709_p5), %v476_v42, %v475_v39  ;;  %v477_v44 = vld [vmem:[#allocation9 + $0x20] sm:$0xff] (!%p709_p5)  ;;  %v478_v45 = vld [vmem:[#allocation9 + $0x28] sm:$0xff] (!%p709_p5)  ;;  %v479_v47 = vld [vmem:[#allocation9 + $0x30] sm:$0xff] (!%p709_p5) }
  0xd4   : > { %771 = vmatprep.mubr.msk.f32.mxu1 (!%p709_p5), %vm1235_vm3, %v1234_v35  ;;  %v781_v46 = vpack.c.bf16 (!%p709_p5), %v478_v45, %v477_v44  ;;  %v480_v48 = vld [vmem:[#allocation9 + $0x38] sm:$0xff] (!%p709_p5)  ;;  %v481_v50 = vld [vmem:[#allocation9 + $0x40] sm:$0xff] (!%p709_p5)  ;;  %v482_v51 = vld [vmem:[#allocation9 + $0x48] sm:$0xff] (!%p709_p5) }
  0xd5   : > { %776 = vmatpush3.bf16.msra.mxu1 (!%p709_p5), %v775_v41  ;;  %v784_v49 = vpack.c.bf16 (!%p709_p5), %v480_v48, %v479_v47  ;;  %v787_v52 = vpack.c.bf16 (!%p709_p5), %v482_v51, %v481_v50  ;;  %v483_v53 = vld [vmem:[#allocation9 + $0x50] sm:$0xff] (!%p709_p5)  ;;  %v484_v54 = vld [vmem:[#allocation9 + $0x58] sm:$0xff] (!%p709_p5)  ;;  %v485_v56 = vld [vmem:[#allocation9 + $0x60] sm:$0xff] (!%p709_p5) }
  0xd6   : > { %777 = vmatprep.subr.bf16.mxu1 (!%p709_p5), %v1236_v40  ;;  %v790_v55 = vpack.c.bf16 (!%p709_p5), %v484_v54, %v483_v53  ;;  %v486_v57 = vld [vmem:[#allocation9 + $0x68] sm:$0xff] (!%p709_p5)  ;;  %v487_v59 = vld [vmem:[#allocation9 + $0x70] sm:$0xff] (!%p709_p5)  ;;  %v488_v60 = vld [vmem:[#allocation9 + $0x78] sm:$0xff] (!%p709_p5) }
  0xd7   : > { %v793_v58 = vpack.c.bf16 (!%p709_p5), %v486_v57, %v485_v56  ;;  %v796_v61 = vpack.c.bf16 (!%p709_p5), %v488_v60, %v487_v59  ;;  %v394_v62 = vld [vmem:[#allocation8] sm:$0x1] (!%p709_p5)  ;;  %v489_v3 = vld [vmem:[#allocation11] sm:$0x1] (!%p709_p5) }
  0xd9   : > { %779 = vmatpush3.bf16.msra.mxu1 (!%p709_p5), %v778_v43 }
  0xda   : > { %780 = vmatprep.subr.bf16.mxu1 (!%p709_p5), %v1236_v40 }
  0xdd   : > { %782 = vmatpush3.bf16.msra.mxu1 (!%p709_p5), %v781_v46 }
  0xde   : > { %783 = vmatprep.subr.bf16.mxu1 (!%p709_p5), %v1236_v40 }
  0xe1   : > { %785 = vmatpush3.bf16.msra.mxu1 (!%p709_p5), %v784_v49 }
  0xe2   : > { %786 = vmatprep.subr.bf16.mxu1 (!%p709_p5), %v1236_v40 }
  0xe5   : > { %788 = vmatpush3.bf16.msra.mxu1 (!%p709_p5), %v787_v52 }
  0xe6   : > { %789 = vmatprep.subr.bf16.mxu1 (!%p709_p5), %v1236_v40 }
  0xe9   : > { %791 = vmatpush3.bf16.msra.mxu1 (!%p709_p5), %v790_v55 }
  0xea   : > { %792 = vmatprep.subr.bf16.mxu1 (!%p709_p5), %v1236_v40 }
  0xed   : > { %794 = vmatpush3.bf16.msra.mxu1 (!%p709_p5), %v793_v58 }
  0xee   : > { %795 = vmatprep.subr.bf16.mxu1 (!%p709_p5), %v1236_v40 }
  0xf1   : > { %797 = vmatpush3.bf16.msra.mxu1 (!%p709_p5), %v796_v61 }
 0x158   : > { %v318_v15 = vpop.xlane.xlu0 %317 }
 0x159   : > { %v323_v17 = vrot.slane %v318_v15, %v322_v11  ;;  %v327_v18 = vrot.slane %v318_v15, %v326_v12  ;;  %v331_v19 = vrot.slane %v318_v15, %v330_v13  ;;  %v335_v20 = vrot.slane %v318_v15, %v334_v14 }
 0x15b   : > { %v336_v21 = vcombine.low %v323_v17, %v327_v18  ;;  %v337_v22 = vcombine.low %v331_v19, %v335_v20 }
 0x15d   : > { %v344_v23 = vrot.slane %v336_v21, %v343_v16  ;;  %v351_v24 = vrot.slane %v337_v22, %v343_v16 }
 0x15f   : > { %v352_v25 = vcombine.low %v344_v23, %v351_v24 }
 0x161   : > { %v359_v26 = vrot.slane %v352_v25, %v343_v16 }
 0x163   : > { %361 = vperm.xlu0 %949, %v359_v26  }
 0x1e2   : > { %v362_v27 = vpop.permute.xlu0 %361 }
 0x1e3   : > { %v368_v28 = vrot.slane %v362_v27, %v367_v7 }
 0x1e5   : > { %v375_v29 = vrot.slane %v368_v28, %v343_v16  ;;  %390 = sbr.rel (%p709_p5) target bundleno = 932 (0x3a4), region = 68 }
 0x1e7   : > { %v382_v31 = vrot.slane %v375_v29, %v343_v16 }
 0x1e9   : > { %v384_v32 = vadd.f32 %v382_v31, %v313_v30 }
 0x1eb   : > { %386 = vst.msk [vmem:[#allocation2] sm:$0x1] %vm385_vm2, %v384_v32 }
 0x1f2   : > { %v391_v34 = vld [vmem:[#allocation2] sm:$0x1] }
 0x1f3   : > { %v392_v36 = vmul.f32 0.00390625, %v391_v34 }
 0x1f5   : > { %737 = vmatmul.mubr.msk.f32.vlgmr.msra.gmra.mrb[0].mxu0 %vm395_vm4, %v392_v36 }
 0x2c8   : > { %v468_v63 = vpop.f32.mrb[0].mxu0 }
 0x2c9   : > { %v469_v0 = vadd.f32 %v468_v63, %v394_v62  ;;  %v738_v1 = vpop.f32.mrb[1].mxu0 }
 0x2cb   : > { %v472_v2 = vmax.f32 %v469_v0, 0.0 }
 0x2cd   : > { %772 = vmatmul.mubr.f32.vlgmr.msra.gmra.mrb[0].mxu1 %v472_v2 }
 0x3a0   : > { %v556_v4 = vpop.f32.mrb[0].mxu1 }
 0x3a1   : > { %v557_v5 = vadd.f32 %v556_v4, %v489_v3  ;;  %v773_v6 = vpop.f32.mrb[1].mxu1 }
 0x3a3   : > { %560 = vst [vmem:[%s1546_s24] sm:$0x1] %v557_v5 }
 0x3a4 PF: > { %s1654_s30 = sld [smem:[#allocation18_spill]]  ;;  %s1655_s1 = sld [smem:[#allocation22_spill]] }
 0x3a5   : > { %s574_s10 = sshll.u32 %s1546_s24, 4  ;;  %s562_s15 = scalar_lea.sflag [#allocation5], %s305_s21  ;;  %s575_s10 = int_to_ptr.vmem [resolvable:$true] %s574_s10 }
 0x3a6   : > { %s1092_s16 = scalar_lea.vmem %s575_s10, 16  ;;  %p1656_p1 = scmp.ne.s32.totalorder %s1645_s29, 0 }
 0x3a7   : > { %p1093_p6 = scmp.ne.s32.totalorder %s575_s10, %s1092_s16  ;;  %s1237_s5 = smov [#allocation12]  }
 0x3a8   : > { %s1096_s17 = sshll.u32 %s1237_s5, 4  ;;  %s1097_s17 = int_to_ptr.vmem [resolvable:$false] %s1096_s17 }
 0x3a9   : > { %p1094_p4 = pnand %p1093_p6, %p1656_p1  ;;  %s1098_s0 = scalar_lea.vmem %s1097_s17, 32 }
 0x3aa   : > { %s712_s7 = sshll.u32 %s1654_s30, 4  ;;  %p1099_p9 = scmp.lt.s32.totalorder %s575_s10, %s1097_s17 }
 0x3ab   : > { %s1557_s11 = scalar_lea.hbm %s1655_s1, %s712_s7  ;;  %p1095_p7 = pneg %p1094_p4 }
 0x3ac   : > { %p1100_p8 = scmp.lt.s32.totalorder %s1098_s0, %s1092_s16 }
 0x3ae   : > { %p1101_p3 = por %p1100_p8, %p1099_p9 }
 0x3b0   : > { %p1102_p13 = pnand %p1101_p3, %p1095_p7 }
 0x3b2   : > { %1105 = shalt.err (!%p1102_p13)
}
 0x3b3   : > { %s1106_s21 = scalar_lea.hbm %s1557_s11, 16  ;;  %s1110_s7 = scalar_lea.hbm %s1655_s1, 32 }
 0x3b4   : > { %p1107_p0 = scmp.ne.s32.totalorder %s1557_s11, %s1106_s21  ;;  %p1111_p12 = scmp.lt.u32.totalorder %s1557_s11, %s1655_s1 }
 0x3b5   : > { %p1112_p10 = scmp.lt.u32.totalorder %s1110_s7, %s1106_s21  ;;  %p1114_p6 = scmp.lt.u32.totalorder %s1106_s21, %s1557_s11 }
 0x3b6   : > { %p1108_p2 = pnand %p1107_p0, %p1656_p1 }
 0x3b7   : > { %p1113_p5 = por %p1112_p10, %p1111_p12 }
 0x3b8   : > { %p1109_p11 = pneg %p1108_p2 }
 0x3b9   : > { %p1115_p4 = por %p1114_p6, %p1113_p5 }
 0x3bb   : > { %p1116_p7 = pnand %p1115_p4, %p1109_p11 }
 0x3bd   : > { %1119 = shalt.err (!%p1116_p7)
}
 0x3be   : > { %816 = dma.vmem_to_hbm [thread:$0]  (%p1656_p1), %s575_s10, 16, %s1557_s11, %s562_s15  }
 0x3bf PF: > { %p848_p9 = scmp.ge.s32.totalorder %s1222_s28, 2  ;;  %s586_s16 = sand.u32 1, %s1182_s18  }
 0x3c0   : > { %p1657_p8 = scmp.ne.s32.totalorder %s1646_s6, 0  ;;  %s587_s5 = scalar_lea.sflag [#allocation5], %s586_s16 }
 0x3c2   : > { %p836_p3 = pnand %p848_p9, %p1657_p8 }
 0x3c4   : > { %1177 = dma.done.wait (!%p836_p3), %s587_s5, 16  }
 0x3c5   : > { %1179 = vsyncadd (!%p836_p3), %s587_s5, 4294967280  ;;  %s23_s28 = sadd.s32 1, %s1222_s28   ;;  %s1658_s29 = smov %s1674_s25 }
 0x3c6   : > { %p20_p13 = scmp.ge.s32.totalorder %s23_s28, 6   ;;  %s1659_s18 = smov %s1186_s19 }
 0x3c7   : > { %s1660_s19 = smov %s1190_s20  ;;  %s1661_s20 = smov %s1474_s12 }
 0x3c8   : > { %s1662_s21 = smov %s1198_s22  ;;  %s1663_s22 = smov %s1202_s23 }
 0x3c9   : > { %s1664_s23 = smov %s1477_s14  ;;  %s1665_s24 = smov %s1214_s26 }
 0x3ca   : > { %s1666_s25 = smov %s1218_s27  ;;  %s1667_s26 = smov %s1670_s9 }
 0x3cb   : > { %s1668_s27 = smov %s1658_s29  ;;  %22 = sbr.rel (!%p20_p13) target bundleno = 15 (0xf), region = 109 }
 0x3d2   :  { %591 = vsyncpa [#allocation4], 1 }
 0x3d3   :  { %593 = vsyncpa [#allocation4 + $0x1], 1 }
 0x3d4   :  { %594 = vsyncpa [#allocation7], 1 }
 0x3d5   :  { %595 = vsyncpa [#allocation10], 1 }
 0x3d6   :  { %596 = vsyncpa [#allocation5], 1 }
 0x3d7   :  { %598 = vsyncpa [#allocation5 + $0x1], 1 }

</bundles_post_ra>
